<compile_context>
chip_gen: v7x
topology: tpu7x:2x2x1
jax: 0.10.0
libtpu: 0.0.40
codegen_flags: <defaults>
</compile_context>

<pallas_src>
import jax
import jax.numpy as jnp
from jax import lax
from jax.experimental import pallas as pl
from jax.experimental.pallas import tpu as pltpu

_REF_PREC = lax.Precision.HIGHEST   # reference path only


# ----------------------------------------------------------------------------
# Kernel: 3 lane-dense matmuls (bf16 in, f32 accumulate) + f32 bias / ReLU.
# ----------------------------------------------------------------------------
def _vad_kernel(x_ref, w1_ref, b1_ref, w2_ref, b2_ref, wl_ref, bl_ref, o_ref):
    # x_ref: (L*C, B) bf16, batch on lanes.  Weights: bf16 block-Toeplitz.
    # Conv1d #1 + BN1 (folded) + ReLU  ->  one (L1*O1, L*C) x (L*C, B) matmul.
    y1 = jnp.dot(w1_ref[...], x_ref[...], preferred_element_type=jnp.float32)
    y1 = jnp.maximum(y1 + b1_ref[...], 0.0)                 # f32, (L1*O1, B)

    # Conv1d #2 (stride folded into the Toeplitz weight) + BN2 + ReLU.
    y2 = jnp.dot(w2_ref[...], y1.astype(jnp.bfloat16),
                 preferred_element_type=jnp.float32)
    y2 = jnp.maximum(y2 + b2_ref[...], 0.0)                 # f32, (L2*O2, B)

    # Flatten + Linear: single (2, L2*O2) x (L2*O2, B) matmul, lane-dense out.
    out = jnp.dot(wl_ref[...], y2.astype(jnp.bfloat16),
                  preferred_element_type=jnp.float32)
    o_ref[...] = out + bl_ref[...]                          # (2, B) f32


def cnn_vad_forward(x_ncl, kernel_params, *, block_b=256):
    """x_ncl: (N, C, L) f32 in PyTorch layout.  Returns (N, 2) f32."""
    w1, b1, w2, b2, wl, bl = kernel_params
    N, C, L = x_ncl.shape
    B = block_b
    n_pad = pl.cdiv(N, B) * B

    # (N, C, L) -> (L, C, N) -> (L*C, N): batch on lanes, flat row idx = t*C+c.
    x_flat = jnp.transpose(x_ncl, (2, 1, 0)).reshape(L * C, N).astype(jnp.bfloat16)
    if n_pad != N:
        x_flat = jnp.pad(x_flat, ((0, 0), (0, n_pad - N)))

    def full_spec(a):
        zeros = (0,) * a.ndim
        return pl.BlockSpec(a.shape, lambda n, _z=zeros: _z)

    out = pl.pallas_call(
        _vad_kernel,
        out_shape=jax.ShapeDtypeStruct((2, n_pad), jnp.float32),
        grid=(n_pad // B,),
        in_specs=[pl.BlockSpec((L * C, B), lambda n: (0, n))]
        + [full_spec(a) for a in (w1, b1, w2, b2, wl, bl)],
        out_specs=pl.BlockSpec((2, B), lambda n: (0, n)),
        compiler_params=pltpu.CompilerParams(
            dimension_semantics=("parallel",)),   # batch axis -> v7x both TCs
    )(x_flat, w1, b1, w2, b2, wl, bl)
    return out[:, :N].T                                     # (N, 2)


# ----------------------------------------------------------------------------
# Init-time parameter construction (runs once, outside the kernel).
# ----------------------------------------------------------------------------
def _conv_toeplitz(w, length_in, stride):
    """Dense Conv1d weight (O, Cin, K) -> block-Toeplitz (L_out*O, L_in*Cin).

    Row index = t_out*O + o, column index = t_in*Cin + c, so that
    `toeplitz @ x_flat` equals a VALID Conv1d with the given stride when
    x_flat rows are ordered t*Cin + c.
    """
    O, Cin, K = w.shape
    length_out = (length_in - K) // stride + 1
    t_out = jnp.arange(length_out)[:, None, None, None]
    o = jnp.arange(O)[None, :, None, None]
    t_in = jnp.arange(length_in)[None, None, :, None]
    c = jnp.arange(Cin)[None, None, None, :]
    k = t_in - t_out * stride
    vals = jnp.where((k >= 0) & (k < K), w[o, c, jnp.clip(k, 0, K - 1)], 0.0)
    return vals.reshape(length_out * O, length_in * Cin)


def init_params(key, in_features, kernel_size, kernel_size2, base_filters,
                stride, seq_len):
    """Deterministic synthetic params in torch layouts + fused kernel layouts."""
    eps = 1e-5
    C, O1, O2 = in_features, base_filters, base_filters
    L = seq_len
    L1 = L - (kernel_size - 1)
    L2 = (L1 - kernel_size2) // stride + 1
    F = base_filters // stride * (seq_len - (kernel_size - 1) - (kernel_size2 - 1))
    assert F == O2 * L2, "Linear in_features must match flattened conv output"

    ks = jax.random.split(key, 14)
    # BatchNorm1d #1 (eval): gamma/beta/running stats -> scale/bias
    g1 = 1.0 + 0.1 * jax.random.normal(ks[0], (C,), jnp.float32)
    be1 = 0.1 * jax.random.normal(ks[1], (C,), jnp.float32)
    rm1 = 0.1 * jax.random.normal(ks[2], (C,), jnp.float32)
    rv1 = jnp.abs(jax.random.normal(ks[3], (C,), jnp.float32)) + 0.5
    s1 = g1 / jnp.sqrt(rv1 + eps)
    bb1 = be1 - rm1 * s1
    # Conv1d #1, torch layout (O1, C, K1)
    w1_t = 0.1 * jax.random.normal(ks[4], (O1, C, kernel_size), jnp.float32)
    cb1 = 0.1 * jax.random.normal(ks[5], (O1,), jnp.float32)
    # BatchNorm1d #2
    g2 = 1.0 + 0.1 * jax.random.normal(ks[6], (O1,), jnp.float32)
    be2 = 0.1 * jax.random.normal(ks[7], (O1,), jnp.float32)
    rm2 = 0.1 * jax.random.normal(ks[8], (O1,), jnp.float32)
    rv2 = jnp.abs(jax.random.normal(ks[9], (O1,), jnp.float32)) + 0.5
    s2 = g2 / jnp.sqrt(rv2 + eps)
    bb2 = be2 - rm2 * s2
    # Conv1d #2, torch layout (O2, O1, K2)
    w2_t = 0.1 * jax.random.normal(ks[10], (O2, O1, kernel_size2), jnp.float32)
    cb2 = 0.1 * jax.random.normal(ks[11], (O2,), jnp.float32)
    # Linear, torch layout (2, F); nn.Flatten index is channel-major f = o*L2+t
    wl_t = 0.1 * jax.random.normal(ks[12], (2, F), jnp.float32)
    bl = 0.1 * jax.random.normal(ks[13], (2,), jnp.float32)

    torch_params = (s1, bb1, w1_t, cb1, s2, bb2, w2_t, cb2, wl_t, bl)

    # --- Fold eval-mode BatchNorm into the conv weights/biases (exact) ------
    w1_f = w1_t * s1[None, :, None]
    b1_f = cb1 + jnp.einsum("ock,c->o", w1_t, bb1)
    w2_f = w2_t * s2[None, :, None]
    b2_f = cb2 + jnp.einsum("ock,c->o", w2_t, bb2)

    # --- Express each conv as a single block-Toeplitz matmul ----------------
    W1 = _conv_toeplitz(w1_f, L, 1)                    # (L1*O1, L*C)
    W2 = _conv_toeplitz(w2_f, L1, stride)              # (L2*O2, L1*O1)
    # Kernel y2 rows are ordered t2*O2 + o2; torch Flatten is o2*L2 + t2.
    WL = wl_t.reshape(2, O2, L2).transpose(0, 2, 1).reshape(2, L2 * O2)

    kernel_params = (
        W1.astype(jnp.bfloat16),
        jnp.tile(b1_f, L1).reshape(L1 * O1, 1),        # f32 bias, (rows, 1)
        W2.astype(jnp.bfloat16),
        jnp.tile(b2_f, L2).reshape(L2 * O2, 1),
        WL.astype(jnp.bfloat16),
        bl.reshape(2, 1),
    )
    return torch_params, kernel_params


# ----------------------------------------------------------------------------
# Pure-JAX f32 reference with PyTorch (NCL) semantics, eval mode, unfused BN.
# ----------------------------------------------------------------------------
def ref_forward(x_ncl, torch_params, *, stride):
    (s1, bb1, w1_t, cb1, s2, bb2, w2_t, cb2, wl_t, bl) = torch_params
    h = x_ncl * s1[None, :, None] + bb1[None, :, None]
    y1 = lax.conv_general_dilated(h, w1_t, (1,), 'VALID',
                                  dimension_numbers=('NCH', 'OIH', 'NCH'),
                                  precision=_REF_PREC)
    y1 = jnp.maximum(y1 + cb1[None, :, None], 0.0)
    y1 = y1 * s2[None, :, None] + bb2[None, :, None]
    y2 = lax.conv_general_dilated(y1, w2_t, (stride,), 'VALID',
                                  dimension_numbers=('NCH', 'OIH', 'NCH'),
                                  precision=_REF_PREC)
    y2 = jnp.maximum(y2 + cb2[None, :, None], 0.0)
    flat = y2.reshape(y2.shape[0], -1)          # channel-major, matches Flatten
    return jnp.dot(flat, wl_t.T, precision=_REF_PREC) + bl[None, :]


if __name__ == "__main__":
    # Config consistent with the module's constructor.
    in_features, kernel_size, kernel_size2 = 4, 3, 3
    base_filters, dropout_rate, stride, seq_len = 8, 0.1, 2, 16
    N = 200                       # exercises lane padding of the batch block

    key = jax.random.PRNGKey(0)
    kx, kp = jax.random.split(key)
    x = jax.random.normal(kx, (N, in_features, seq_len), jnp.float32)

    torch_params, kernel_params = init_params(
        kp, in_features, kernel_size, kernel_size2, base_filters, stride, seq_len)

    out = cnn_vad_forward(x, kernel_params, block_b=256)
    out = jax.block_until_ready(out)

    ref = ref_forward(x, torch_params, stride=stride)
    assert out.shape == (N, 2)
    # bf16 matmul operands (per perf review) -> relaxed parity tolerance vs f32.
    assert jnp.allclose(out, ref, atol=5e-2, rtol=5e-2), (out, ref)
    print("KERNEL_OK")
</pallas_src>

<mosaic_0001>
module attributes {stable_mosaic.version = 11 : i64} {
  func.func @_vad_kernel(%arg0: i32, %arg1: memref<64x256xbf16, #tpu.memory_space<vmem>>, %arg2: memref<112x64xbf16, #tpu.memory_space<vmem>>, %arg3: memref<112x1xf32, #tpu.memory_space<vmem>>, %arg4: memref<48x112xbf16, #tpu.memory_space<vmem>>, %arg5: memref<48x1xf32, #tpu.memory_space<vmem>>, %arg6: memref<2x48xbf16, #tpu.memory_space<vmem>>, %arg7: memref<2x1xf32, #tpu.memory_space<vmem>>, %arg8: memref<2x256xf32, #tpu.memory_space<vmem>>) attributes {dimension_semantics = [#tpu.dimension_semantics<parallel>], iteration_bounds = array<i64: 1>, scalar_prefetch = 0 : i64, scratch_operands = 0 : i64, tpu.core_type = #tpu.core_type<tc>, window_params = [{transform_indices = @transform_0, window_bounds = array<i64: 64, 256>}, {pipeline_mode = #tpu.pipeline_mode<synchronous>, transform_indices = @transform_1, window_bounds = array<i64: 112, 64>}, {pipeline_mode = #tpu.pipeline_mode<synchronous>, transform_indices = @transform_2, window_bounds = array<i64: 112, 1>}, {pipeline_mode = #tpu.pipeline_mode<synchronous>, transform_indices = @transform_3, window_bounds = array<i64: 48, 112>}, {pipeline_mode = #tpu.pipeline_mode<synchronous>, transform_indices = @transform_4, window_bounds = array<i64: 48, 1>}, {pipeline_mode = #tpu.pipeline_mode<synchronous>, transform_indices = @transform_5, window_bounds = array<i64: 2, 48>}, {pipeline_mode = #tpu.pipeline_mode<synchronous>, transform_indices = @transform_6, window_bounds = array<i64: 2, 1>}, {transform_indices = @transform_7, window_bounds = array<i64: 2, 256>}]} {
    %c0 = arith.constant 0 : index
    %c0_0 = arith.constant 0 : index
    %0 = vector.load %arg2[%c0, %c0_0] : memref<112x64xbf16, #tpu.memory_space<vmem>>, vector<112x64xbf16>
    %c0_1 = arith.constant 0 : index
    %c0_2 = arith.constant 0 : index
    %1 = vector.load %arg1[%c0_1, %c0_2] : memref<64x256xbf16, #tpu.memory_space<vmem>>, vector<64x256xbf16>
    %cst = arith.constant dense<0.000000e+00> : vector<112x256xf32>
    %2 = tpu.matmul %0, %1, %cst {dimension_numbers = #tpu.dot_dimension_numbers<[1], [0], [0], [1], [0, 0, 1, 1], [], []>} : vector<112x64xbf16>, vector<64x256xbf16>, vector<112x256xf32> -> vector<112x256xf32>
    %c0_3 = arith.constant 0 : index
    %c0_4 = arith.constant 0 : index
    %3 = vector.load %arg3[%c0_3, %c0_4] : memref<112x1xf32, #tpu.memory_space<vmem>>, vector<112x1xf32>
    %4 = vector.broadcast %3 : vector<112x1xf32> to vector<112x256xf32>
    %5 = arith.addf %2, %4 : vector<112x256xf32>
    %cst_5 = arith.constant 0.000000e+00 : f32
    %6 = vector.broadcast %cst_5 : f32 to vector<112x256xf32>
    %7 = arith.maximumf %5, %6 : vector<112x256xf32>
    %c0_6 = arith.constant 0 : index
    %c0_7 = arith.constant 0 : index
    %8 = vector.load %arg4[%c0_6, %c0_7] : memref<48x112xbf16, #tpu.memory_space<vmem>>, vector<48x112xbf16>
    %9 = arith.truncf %7 : vector<112x256xf32> to vector<112x256xbf16>
    %cst_8 = arith.constant dense<0.000000e+00> : vector<48x256xf32>
    %10 = tpu.matmul %8, %9, %cst_8 {dimension_numbers = #tpu.dot_dimension_numbers<[1], [0], [0], [1], [0, 0, 1, 1], [], []>} : vector<48x112xbf16>, vector<112x256xbf16>, vector<48x256xf32> -> vector<48x256xf32>
    %c0_9 = arith.constant 0 : index
    %c0_10 = arith.constant 0 : index
    %11 = vector.load %arg5[%c0_9, %c0_10] : memref<48x1xf32, #tpu.memory_space<vmem>>, vector<48x1xf32>
    %12 = vector.broadcast %11 : vector<48x1xf32> to vector<48x256xf32>
    %13 = arith.addf %10, %12 : vector<48x256xf32>
    %cst_11 = arith.constant 0.000000e+00 : f32
    %14 = vector.broadcast %cst_11 : f32 to vector<48x256xf32>
    %15 = arith.maximumf %13, %14 : vector<48x256xf32>
    %c0_12 = arith.constant 0 : index
    %c0_13 = arith.constant 0 : index
    %16 = vector.load %arg6[%c0_12, %c0_13] : memref<2x48xbf16, #tpu.memory_space<vmem>>, vector<2x48xbf16>
    %17 = arith.truncf %15 : vector<48x256xf32> to vector<48x256xbf16>
    %cst_14 = arith.constant dense<0.000000e+00> : vector<2x256xf32>
    %18 = tpu.matmul %16, %17, %cst_14 {dimension_numbers = #tpu.dot_dimension_numbers<[1], [0], [0], [1], [0, 0, 1, 1], [], []>} : vector<2x48xbf16>, vector<48x256xbf16>, vector<2x256xf32> -> vector<2x256xf32>
    %c0_15 = arith.constant 0 : index
    %c0_16 = arith.constant 0 : index
    %19 = vector.load %arg7[%c0_15, %c0_16] : memref<2x1xf32, #tpu.memory_space<vmem>>, vector<2x1xf32>
    %20 = vector.broadcast %19 : vector<2x1xf32> to vector<2x256xf32>
    %21 = arith.addf %18, %20 : vector<2x256xf32>
    %c0_17 = arith.constant 0 : index
    %c0_18 = arith.constant 0 : index
    %22 = vector.load %arg8[%c0_17, %c0_18] : memref<2x256xf32, #tpu.memory_space<vmem>>, vector<2x256xf32>
    tpu.vector_store %arg8[%c0_17, %c0_18], %21 {strides = array<i32>} : memref<2x256xf32, #tpu.memory_space<vmem>>, vector<2x256xf32>,
    return
  }
  func.func @transform_0(%arg0: i32) -> (i32, i32) {
    %c0_i32 = arith.constant 0 : i32
    %c0_i32_0 = arith.constant 0 : i32
    return %c0_i32, %arg0 : i32, i32
  }
  func.func @transform_1(%arg0: i32) -> (i32, i32) {
    %c0_i32 = arith.constant 0 : i32
    %c0_i32_0 = arith.constant 0 : i32
    %c0_i32_1 = arith.constant 0 : i32
    return %c0_i32, %c0_i32_0 : i32, i32
  }
  func.func @transform_2(%arg0: i32) -> (i32, i32) {
    %c0_i32 = arith.constant 0 : i32
    %c0_i32_0 = arith.constant 0 : i32
    %c0_i32_1 = arith.constant 0 : i32
    return %c0_i32, %c0_i32_0 : i32, i32
  }
  func.func @transform_3(%arg0: i32) -> (i32, i32) {
    %c0_i32 = arith.constant 0 : i32
    %c0_i32_0 = arith.constant 0 : i32
    %c0_i32_1 = arith.constant 0 : i32
    return %c0_i32, %c0_i32_0 : i32, i32
  }
  func.func @transform_4(%arg0: i32) -> (i32, i32) {
    %c0_i32 = arith.constant 0 : i32
    %c0_i32_0 = arith.constant 0 : i32
    %c0_i32_1 = arith.constant 0 : i32
    return %c0_i32, %c0_i32_0 : i32, i32
  }
  func.func @transform_5(%arg0: i32) -> (i32, i32) {
    %c0_i32 = arith.constant 0 : i32
    %c0_i32_0 = arith.constant 0 : i32
    %c0_i32_1 = arith.constant 0 : i32
    return %c0_i32, %c0_i32_0 : i32, i32
  }
  func.func @transform_6(%arg0: i32) -> (i32, i32) {
    %c0_i32 = arith.constant 0 : i32
    %c0_i32_0 = arith.constant 0 : i32
    %c0_i32_1 = arith.constant 0 : i32
    return %c0_i32, %c0_i32_0 : i32, i32
  }
  func.func @transform_7(%arg0: i32) -> (i32, i32) {
    %c0_i32 = arith.constant 0 : i32
    %c0_i32_0 = arith.constant 0 : i32
    return %c0_i32, %arg0 : i32, i32
  }
}

</mosaic_0001>

<bundles_post_ra>
// kernel: tpu_custom_call.1
= control target key start
LH: loop header
LB: loop body
LE: loop exit
PB: predicated region body
PF: predicated region fallthrough
CT: control target
= control target key end

     0   :  { %v682_v2 = vmov 0   ;;  %vm209_vm0 = vcmask 523264   ;;  %s876_s0 = inlined_call_operand.vmem [shape: bf16[64,256], index: 0, kind: input, shape index: {}]   ;;  %s877_s1 = inlined_call_operand.vmem [shape: bf16[112,64], index: 1, kind: input, shape index: {}]   ;;  %s878_s2 = inlined_call_operand.vmem [shape: f32[112,1], index: 2, kind: input, shape index: {}]   ;;  %s879_s3 = inlined_call_operand.vmem [shape: bf16[48,112], index: 3, kind: input, shape index: {}]   ;;  %s880_s4 = inlined_call_operand.vmem [shape: f32[48,1], index: 4, kind: input, shape index: {}]   ;;  %s881_s5 = inlined_call_operand.vmem [shape: bf16[2,48], index: 5, kind: input, shape index: {}]   ;;  %s882_s6 = inlined_call_operand.vmem [shape: f32[2,1], index: 6, kind: input, shape index: {}]   ;;  %s883_s7 = inlined_call_operand.hbm [shape: f32[2,256], index: 7, kind: output, shape index: {}]  }
   0x1   :  { %v636_v0 = vld [vmem:[%s876_s0 + $0x4] ss:$8 sps:$4 sm:$0xff]   ;;  %v638_v1 = vld [vmem:[%s876_s0] ss:$8 sps:$4 sm:$0xff]   ;;  %263 = vmatprep.mubr.bf16.mxu0 %v682_v2  ;;  %634 = vset.pattern.permute.xlu0 %v682_v2  ;;  %v639_v3 = vld [vmem:[%s876_s0 + $0x14] ss:$8 sps:$4 sm:$0xff]  }
   0x2   :  { %231 = vmatprep.subr.bf16.mxu0 %v636_v0  ;;  %635 = vset.pattern.permute.xlu1 %v682_v2  ;;  %v641_v4 = vld [vmem:[%s876_s0 + $0x10] ss:$8 sps:$4 sm:$0xff]   ;;  %v642_v5 = vld [vmem:[%s876_s0 + $0x24] ss:$8 sps:$4 sm:$0xff]   ;;  %v644_v6 = vld [vmem:[%s876_s0 + $0x20] ss:$8 sps:$4 sm:$0xff]  }
   0x3   :  { %232 = vmatpush1.bf16.msra.mxu0 %v638_v1  ;;  %475 = vmatprep.mubr.bf16.mxu1 %v682_v2  ;;  %v645_v7 = vld [vmem:[%s876_s0 + $0x34] ss:$8 sps:$4 sm:$0xff]   ;;  %v647_v8 = vld [vmem:[%s876_s0 + $0x30] ss:$8 sps:$4 sm:$0xff]   ;;  %v50_v9 = vld [vmem:[%s878_s2] sm:$0xff] }
   0x4   :  { %233 = vmatprep.subr.bf16.mxu0 %v639_v3  ;;  %66 = vperm.xlu0 %634, %v50_v9   ;;  %v52_v10 = vld [vmem:[%s878_s2 + $0x10] sm:$0xff]  ;;  %v648_v11 = vld [vmem:[%s877_s1] sm:$0xff]   ;;  %v51_v12 = vld [vmem:[%s878_s2 + $0x8] sm:$0xff] }
   0x5   :  { %76 = vperm.xlu1 %635, %v52_v10   ;;  %v53_v13 = vld [vmem:[%s878_s2 + $0x18] sm:$0xff]  ;;  %v54_v14 = vld [vmem:[%s878_s2 + $0x20] sm:$0xff]  ;;  %v55_v15 = vld [vmem:[%s878_s2 + $0x28] sm:$0xff] }
   0x7   :  { %234 = vmatpush1.bf16.msra.mxu0 %v641_v4 }
   0x8   :  { %235 = vmatprep.subr.bf16.mxu0 %v642_v5  ;;  %71 = vperm.xlu0 %634, %v51_v12  }
   0x9   :  { %81 = vperm.xlu1 %635, %v53_v13  }
   0xb   :  { %236 = vmatpush1.bf16.msra.mxu0 %v644_v6 }
   0xc   :  { %237 = vmatprep.subr.bf16.mxu0 %v645_v7  ;;  %86 = vperm.xlu0 %634, %v54_v14  }
   0xf   :  { %238 = vmatpush1.bf16.msra.mxu0 %v647_v8 }
  0x12   :  { %617 = vmatmul.mubr.msk.bf16.vlgmr.msra.gmra.mrb[0].mxu0 %vm209_vm0, %v648_v11 }
  0x13   :  { %273 = vmatprep.mubr.bf16.mxu0 %v682_v2 }
  0x14   :  { %12 = vsyncpa [#allocation3], 0  ;;  %v649_v16 = vld [vmem:[%s877_s1 + $0x8] sm:$0xff]   ;;  %v56_v17 = vld [vmem:[%s878_s2 + $0x30] sm:$0xff]  ;;  %91 = vperm.xlu1 %635, %v55_v15   ;;  %vm433_vm1 = vcmask 916480   ;;  %vm531_vm2 = vcmask 392192  }
  0x15   :  { %v57_v18 = vld [vmem:[%s878_s2 + $0x38] sm:$0xff]  ;;  %96 = vperm.xlu0 %634, %v56_v17   ;;  %v58_v19 = vld [vmem:[%s878_s2 + $0x40] sm:$0xff]  ;;  %v59_v20 = vld [vmem:[%s878_s2 + $0x48] sm:$0xff]  ;;  %s683_s27 = smov [#allocation2]  }
  0x16   :  { %v650_v21 = vld [vmem:[%s877_s1 + $0x10] sm:$0xff]   ;;  %v61_v23 = vld [vmem:[%s878_s2 + $0x58] sm:$0xff]  ;;  %v62_v24 = vld [vmem:[%s878_s2 + $0x60] sm:$0xff]  ;;  %s594_s28 = sshll.u32 %s683_s27, 4  ;;  %s595_s28 = int_to_ptr.vmem [resolvable:$true] %s594_s28 }
  0x17   :  { %v60_v22 = vld [vmem:[%s878_s2 + $0x50] sm:$0xff]  ;;  %v63_v25 = vld [vmem:[%s878_s2 + $0x68] sm:$0xff]  ;;  %v651_v26 = vld [vmem:[%s877_s1 + $0x18] sm:$0xff]   ;;  %s658_s29 = scalar_lea.vmem %s595_s28, 64  ;;  %p663_p1 = scmp.lt.s32.totalorder %s595_s28, %s595_s28 }
  0x18   :  { %101 = vperm.xlu1 %635, %v57_v18   ;;  %v382_v27 = vld [vmem:[%s880_s4] sm:$0xff]  ;;  %v383_v28 = vld [vmem:[%s880_s4 + $0x8] sm:$0xff]  ;;  %v384_v29 = vld [vmem:[%s880_s4 + $0x10] sm:$0xff]  ;;  %p659_p0 = scmp.ne.s32.totalorder %s595_s28, %s658_s29  ;;  %p664_p2 = scmp.lt.s32.totalorder %s658_s29, %s658_s29 }
  0x19   :  { %106 = vperm.xlu0 %634, %v58_v19   ;;  %v385_v30 = vld [vmem:[%s880_s4 + $0x18] sm:$0xff]  ;;  %v652_v31 = vld [vmem:[%s877_s1 + $0x20] sm:$0xff]   ;;  %v387_v33 = vld [vmem:[%s880_s4 + $0x28] sm:$0xff] }
  0x1a   :  { %618 = vmatmul.mubr.msk.bf16.gmra.mrb[4].mxu0 %vm209_vm0, %v649_v16  ;;  %v386_v32 = vld [vmem:[%s880_s4 + $0x20] sm:$0xff]  ;;  %v653_v35 = vld [vmem:[%s877_s1 + $0x28] sm:$0xff]   ;;  %v654_v36 = vld [vmem:[%s877_s1 + $0x30] sm:$0xff]   ;;  %p665_p3 = por %p664_p2, %p663_p1 }
  0x1b   :  { %283 = vmatprep.mubr.bf16.mxu0 %v682_v2  ;;  %v525_v34 = vld [vmem:[%s882_s6] sm:$0x3] }
  0x1c   :  { %111 = vperm.xlu1 %635, %v59_v20   ;;  %p666_p4 = pnand %p665_p3, %p659_p0 }
  0x1d   :  { %116 = vperm.xlu0 %634, %v60_v22  }
  0x20   :  { %121 = vperm.xlu1 %635, %v61_v23  }
  0x21   :  { %126 = vperm.xlu0 %634, %v62_v24  }
  0x22   :  { %619 = vmatmul.mubr.msk.bf16.gmra.mrb[8].mxu0 %vm209_vm0, %v650_v21 }
  0x23   :  { %293 = vmatprep.mubr.bf16.mxu0 %v682_v2 }
  0x24   :  { %131 = vperm.xlu1 %635, %v63_v25  }
  0x25   :  { %390 = vperm.xlu0 %634, %v382_v27  }
  0x28   :  { %395 = vperm.xlu1 %635, %v383_v28  }
  0x29   :  { %400 = vperm.xlu0 %634, %v384_v29  }
  0x2a   :  { %620 = vmatmul.mubr.msk.bf16.gmra.mrb[12].mxu0 %vm209_vm0, %v651_v26 }
  0x2b   :  { %303 = vmatprep.mubr.bf16.mxu0 %v682_v2 }
  0x2c   :  { %405 = vperm.xlu1 %635, %v385_v30  }
  0x2d   :  { %410 = vperm.xlu0 %634, %v386_v32  }
  0x30   :  { %415 = vperm.xlu1 %635, %v387_v33  }
  0x31   :  { %528 = vperm.xlu0 %634, %v525_v34  }
  0x32   :  { %621 = vmatmul.mubr.msk.bf16.gmra.mrb[16].mxu0 %vm209_vm0, %v652_v31 }
  0x33   :  { %313 = vmatprep.mubr.bf16.mxu0 %v682_v2 }
  0x3a   :  { %622 = vmatmul.mubr.msk.bf16.gmra.mrb[20].mxu0 %vm209_vm0, %v653_v35 }
  0x3b   :  { %323 = vmatprep.mubr.bf16.mxu0 %v682_v2 }
  0x42   :  { %623 = vmatmul.mubr.msk.bf16.gmra.mrb[24].mxu0 %vm209_vm0, %v654_v36 }
  0x83   :  { %v67_v37 = vpop.permute.xlu0 %66 }
  0x84   :  { %v77_v46 = vpop.permute.xlu1 %76 }
  0x87   :  { %v72_v41 = vpop.permute.xlu0 %71 }
  0x88   :  { %v82_v57 = vpop.permute.xlu1 %81 }
  0x8b   :  { %v87_v5 = vpop.permute.xlu0 %86 }
  0x93   :  { %v92_v10 = vpop.permute.xlu1 %91 }
  0x94   :  { %v97_v21 = vpop.permute.xlu0 %96 }
  0x97   :  { %v102_v26 = vpop.permute.xlu1 %101 }
  0xe5   :  { %v265_v38 = vpop.f32.mrb[0].mxu0 }
  0xe6   :  { %v266_v39 = vadd.f32 %v265_v38, %v67_v37  ;;  %v267_v40 = vpop.f32.mrb[1].mxu0 }
  0xe7   :  { %v268_v42 = vadd.f32 %v267_v40, %v67_v37  ;;  %v269_v43 = vpop.f32.mrb[2].mxu0  ;;  %v107_v37 = vpop.permute.xlu0 %106 }
  0xe8   :  { %v270_v44 = vadd.f32 %v269_v43, %v72_v41  ;;  %v271_v45 = vpop.f32.mrb[3].mxu0  ;;  %v334_v48 = vmax.f32 %v266_v39, 0.0 }
  0xe9   :  { %v272_v47 = vadd.f32 %v271_v45, %v72_v41  ;;  %v335_v50 = vmax.f32 %v268_v42, 0.0  ;;  %v112_v42 = vpop.permute.xlu1 %111 }
  0xea   :  { %v336_v49 = vmax.f32 %v270_v44, 0.0 }
  0xeb   :  { %v337_v51 = vmax.f32 %v272_v47, 0.0 }
  0xec   :  { %v368_v52 = vpack.c.bf16 %v336_v49, %v334_v48 }
  0xed   :  { %v275_v53 = vpop.f32.mrb[4].mxu0  ;;  %v369_v54 = vpack.c.bf16 %v337_v51, %v335_v50 }
  0xee   :  { %v276_v55 = vadd.f32 %v275_v53, %v77_v46  ;;  %v277_v56 = vpop.f32.mrb[5].mxu0  ;;  %v117_v53 = vpop.permute.xlu0 %116 }
  0xef   :  { %v278_v58 = vadd.f32 %v277_v56, %v77_v46  ;;  %v279_v59 = vpop.f32.mrb[6].mxu0  ;;  %443 = vmatprep.subr.bf16.mxu1 %v369_v54 }
  0xf0   :  { %v280_v60 = vadd.f32 %v279_v59, %v82_v57  ;;  %v281_v61 = vpop.f32.mrb[7].mxu0  ;;  %444 = vmatpush1.bf16.msra.mxu1 %v368_v52  ;;  %v338_v63 = vmax.f32 %v276_v55, 0.0 }
  0xf1   :  { %v282_v62 = vadd.f32 %v281_v61, %v82_v57  ;;  %v339_v1 = vmax.f32 %v278_v58, 0.0  ;;  %v122_v58 = vpop.permute.xlu1 %121 }
  0xf2   :  { %v340_v0 = vmax.f32 %v280_v60, 0.0 }
  0xf3   :  { %v341_v3 = vmax.f32 %v282_v62, 0.0 }
  0xf4   :  { %v370_v4 = vpack.c.bf16 %v340_v0, %v338_v63 }
  0xf5   :  { %v371_v6 = vpack.c.bf16 %v341_v3, %v339_v1  ;;  %v285_v7 = vpop.f32.mrb[8].mxu0 }
  0xf6   :  { %v286_v8 = vadd.f32 %v285_v7, %v87_v5  ;;  %v287_v9 = vpop.f32.mrb[9].mxu0 }
  0xf7   :  { %v288_v11 = vadd.f32 %v287_v9, %v87_v5  ;;  %v289_v12 = vpop.f32.mrb[10].mxu0  ;;  %445 = vmatprep.subr.bf16.mxu1 %v371_v6  ;;  %v127_v6 = vpop.permute.xlu0 %126 }
  0xf8   :  { %v290_v13 = vadd.f32 %v289_v12, %v92_v10  ;;  %v291_v14 = vpop.f32.mrb[11].mxu0  ;;  %446 = vmatpush1.bf16.msra.mxu1 %v370_v4  ;;  %v342_v16 = vmax.f32 %v286_v8, 0.0 }
  0xf9   :  { %v292_v15 = vadd.f32 %v291_v14, %v92_v10  ;;  %v343_v18 = vmax.f32 %v288_v11, 0.0  ;;  %v132_v11 = vpop.permute.xlu1 %131 }
  0xfa   :  { %v344_v17 = vmax.f32 %v290_v13, 0.0 }
  0xfb   :  { %v345_v19 = vmax.f32 %v292_v15, 0.0 }
  0xfc   :  { %v372_v20 = vpack.c.bf16 %v344_v17, %v342_v16 }
  0xfd   :  { %v373_v22 = vpack.c.bf16 %v345_v19, %v343_v18  ;;  %v295_v23 = vpop.f32.mrb[12].mxu0 }
  0xfe   :  { %v296_v24 = vadd.f32 %v295_v23, %v97_v21  ;;  %v297_v25 = vpop.f32.mrb[13].mxu0  ;;  %v655_v23 = vld [vmem:[%s879_s3] sm:$0xff]  }
  0xff   :  { %v298_v27 = vadd.f32 %v297_v25, %v97_v21  ;;  %v299_v28 = vpop.f32.mrb[14].mxu0  ;;  %447 = vmatprep.subr.bf16.mxu1 %v373_v22  ;;  %v657_v25 = vld [vmem:[%s879_s3 + $0x10] sm:$0xff]  }
 0x100   :  { %v300_v29 = vadd.f32 %v299_v28, %v102_v26  ;;  %v301_v30 = vpop.f32.mrb[15].mxu0  ;;  %448 = vmatpush1.bf16.msra.mxu1 %v372_v20  ;;  %v346_v32 = vmax.f32 %v296_v24, 0.0  ;;  %v656_v24 = vld [vmem:[%s879_s3 + $0x8] sm:$0xff]  }
 0x101   :  { %v302_v31 = vadd.f32 %v301_v30, %v102_v26  ;;  %v347_v34 = vmax.f32 %v298_v27, 0.0  ;;  %v391_v26 = vpop.permute.xlu0 %390  ;;  %v396_v30 = vpop.permute.xlu1 %395 }
 0x102   :  { %v348_v33 = vmax.f32 %v300_v29, 0.0 }
 0x103   :  { %v349_v35 = vmax.f32 %v302_v31, 0.0 }
 0x104   :  { %v374_v36 = vpack.c.bf16 %v348_v33, %v346_v32 }
 0x105   :  { %v375_v38 = vpack.c.bf16 %v349_v35, %v347_v34  ;;  %v305_v39 = vpop.f32.mrb[16].mxu0 }
 0x106   :  { %v306_v40 = vadd.f32 %v305_v39, %v107_v37  ;;  %v307_v41 = vpop.f32.mrb[17].mxu0 }
 0x107   :  { %v308_v43 = vadd.f32 %v307_v41, %v107_v37  ;;  %v309_v44 = vpop.f32.mrb[18].mxu0  ;;  %449 = vmatprep.subr.bf16.mxu1 %v375_v38  ;;  %v401_v41 = vpop.permute.xlu0 %400 }
 0x108   :  { %v310_v45 = vadd.f32 %v309_v44, %v112_v42  ;;  %v311_v46 = vpop.f32.mrb[19].mxu0  ;;  %450 = vmatpush1.bf16.msra.mxu1 %v374_v36  ;;  %v350_v48 = vmax.f32 %v306_v40, 0.0 }
 0x109   :  { %v312_v47 = vadd.f32 %v311_v46, %v112_v42  ;;  %v351_v50 = vmax.f32 %v308_v43, 0.0 }
 0x10a   :  { %v352_v49 = vmax.f32 %v310_v45, 0.0  ;;  %v406_v45 = vpop.permute.xlu1 %405 }
 0x10b   :  { %v353_v51 = vmax.f32 %v312_v47, 0.0 }
 0x10c   :  { %v376_v52 = vpack.c.bf16 %v352_v49, %v350_v48 }
 0x10d   :  { %v377_v54 = vpack.c.bf16 %v353_v51, %v351_v50  ;;  %v315_v55 = vpop.f32.mrb[20].mxu0 }
 0x10e   :  { %v316_v56 = vadd.f32 %v315_v55, %v117_v53  ;;  %v317_v57 = vpop.f32.mrb[21].mxu0 }
 0x10f   :  { %v318_v59 = vadd.f32 %v317_v57, %v117_v53  ;;  %v319_v60 = vpop.f32.mrb[22].mxu0  ;;  %451 = vmatprep.subr.bf16.mxu1 %v377_v54 }
 0x110   :  { %v320_v61 = vadd.f32 %v319_v60, %v122_v58  ;;  %v321_v62 = vpop.f32.mrb[23].mxu0  ;;  %452 = vmatpush1.bf16.msra.mxu1 %v376_v52  ;;  %v354_v0 = vmax.f32 %v316_v56, 0.0  ;;  %v411_v56 = vpop.permute.xlu0 %410 }
 0x111   :  { %v322_v63 = vadd.f32 %v321_v62, %v122_v58  ;;  %v355_v3 = vmax.f32 %v318_v59, 0.0 }
 0x112   :  { %v356_v1 = vmax.f32 %v320_v61, 0.0  ;;  %v416_v61 = vpop.permute.xlu1 %415 }
 0x113   :  { %v357_v4 = vmax.f32 %v322_v63, 0.0 }
 0x114   :  { %v378_v5 = vpack.c.bf16 %v356_v1, %v354_v0 }
 0x115   :  { %v379_v7 = vpack.c.bf16 %v357_v4, %v355_v3  ;;  %v325_v8 = vpop.f32.mrb[24].mxu0 }
 0x116   :  { %v326_v9 = vadd.f32 %v325_v8, %v127_v6  ;;  %v327_v10 = vpop.f32.mrb[25].mxu0 }
 0x117   :  { %v328_v12 = vadd.f32 %v327_v10, %v127_v6  ;;  %v329_v13 = vpop.f32.mrb[26].mxu0  ;;  %453 = vmatprep.subr.bf16.mxu1 %v379_v7  ;;  %v518_v10 = vld [vmem:[%s881_s5] sm:$0x1] }
 0x118   :  { %v330_v14 = vadd.f32 %v329_v13, %v132_v11  ;;  %v331_v15 = vpop.f32.mrb[27].mxu0  ;;  %454 = vmatpush1.bf16.msra.mxu1 %v378_v5  ;;  %v358_v17 = vmax.f32 %v326_v9, 0.0 }
 0x119   :  { %v332_v16 = vadd.f32 %v331_v15, %v132_v11  ;;  %v359_v19 = vmax.f32 %v328_v12, 0.0  ;;  %v529_v11 = vpop.permute.xlu0 %528 }
 0x11a   :  { %v360_v18 = vmax.f32 %v330_v14, 0.0 }
 0x11b   :  { %v361_v20 = vmax.f32 %v332_v16, 0.0 }
 0x11c   :  { %v380_v21 = vpack.c.bf16 %v360_v18, %v358_v17 }
 0x11d   :  { %v381_v22 = vpack.c.bf16 %v361_v20, %v359_v19 }
 0x11f   :  { %455 = vmatprep.subr.bf16.mxu1 %v381_v22 }
 0x120   :  { %456 = vmatpush1.bf16.msra.mxu1 %v380_v21 }
 0x123   :  { %627 = vmatmul.mubr.msk.bf16.vlgmr.msra.gmra.mrb[0].mxu1 %vm433_vm1, %v655_v23 }
 0x124   :  { %485 = vmatprep.mubr.bf16.mxu1 %v682_v2 }
 0x12b   :  { %628 = vmatmul.mubr.msk.bf16.gmra.mrb[4].mxu1 %vm433_vm1, %v656_v24 }
 0x12c   :  { %495 = vmatprep.mubr.bf16.mxu1 %v682_v2 }
 0x133   :  { %629 = vmatmul.mubr.msk.bf16.gmra.mrb[8].mxu1 %vm433_vm1, %v657_v25 }
 0x134   :  { %567 = vmatprep.mubr.bf16.mxu1 %v682_v2 }
 0x1f6   :  { %v477_v27 = vpop.f32.mrb[0].mxu1 }
 0x1f7   :  { %v478_v28 = vadd.f32 %v477_v27, %v391_v26  ;;  %v479_v29 = vpop.f32.mrb[1].mxu1 }
 0x1f8   :  { %v480_v31 = vadd.f32 %v479_v29, %v391_v26  ;;  %v481_v32 = vpop.f32.mrb[2].mxu1 }
 0x1f9   :  { %v482_v33 = vadd.f32 %v481_v32, %v396_v30  ;;  %v483_v34 = vpop.f32.mrb[3].mxu1  ;;  %v506_v36 = vmax.f32 %v478_v28, 0.0 }
 0x1fa   :  { %v484_v35 = vadd.f32 %v483_v34, %v396_v30  ;;  %v507_v38 = vmax.f32 %v480_v31, 0.0 }
 0x1fb   :  { %v508_v37 = vmax.f32 %v482_v33, 0.0 }
 0x1fc   :  { %v509_v39 = vmax.f32 %v484_v35, 0.0 }
 0x1fd   :  { %v519_v40 = vpack.c.bf16 %v508_v37, %v506_v36 }
 0x1fe   :  { %v520_v42 = vpack.c.bf16 %v509_v39, %v507_v38  ;;  %v487_v43 = vpop.f32.mrb[4].mxu1 }
 0x1ff   :  { %v488_v44 = vadd.f32 %v487_v43, %v401_v41  ;;  %v489_v2 = vpop.f32.mrb[5].mxu1 }
 0x200   :  { %v490_v46 = vadd.f32 %v489_v2, %v401_v41  ;;  %v491_v47 = vpop.f32.mrb[6].mxu1  ;;  %535 = vmatprep.subr.bf16.mxu1 %v520_v42 }
 0x201   :  { %v492_v48 = vadd.f32 %v491_v47, %v406_v45  ;;  %v493_v49 = vpop.f32.mrb[7].mxu1  ;;  %536 = vmatpush1.bf16.msra.mxu1 %v519_v40  ;;  %v510_v51 = vmax.f32 %v488_v44, 0.0 }
 0x202   :  { %v494_v50 = vadd.f32 %v493_v49, %v406_v45  ;;  %v511_v53 = vmax.f32 %v490_v46, 0.0 }
 0x203   :  { %v512_v52 = vmax.f32 %v492_v48, 0.0 }
 0x204   :  { %v513_v54 = vmax.f32 %v494_v50, 0.0 }
 0x205   :  { %v521_v55 = vpack.c.bf16 %v512_v52, %v510_v51 }
 0x206   :  { %v522_v57 = vpack.c.bf16 %v513_v54, %v511_v53  ;;  %v497_v58 = vpop.f32.mrb[8].mxu1 }
 0x207   :  { %v498_v59 = vadd.f32 %v497_v58, %v411_v56  ;;  %v499_v60 = vpop.f32.mrb[9].mxu1 }
 0x208   :  { %v500_v62 = vadd.f32 %v499_v60, %v411_v56  ;;  %v501_v63 = vpop.f32.mrb[10].mxu1  ;;  %537 = vmatprep.subr.bf16.mxu1 %v522_v57 }
 0x209   :  { %v502_v0 = vadd.f32 %v501_v63, %v416_v61  ;;  %v503_v1 = vpop.f32.mrb[11].mxu1  ;;  %538 = vmatpush1.bf16.msra.mxu1 %v521_v55  ;;  %v514_v4 = vmax.f32 %v498_v59, 0.0 }
 0x20a   :  { %v504_v3 = vadd.f32 %v503_v1, %v416_v61  ;;  %v515_v6 = vmax.f32 %v500_v62, 0.0 }
 0x20b   :  { %v516_v5 = vmax.f32 %v502_v0, 0.0 }
 0x20c   :  { %v517_v7 = vmax.f32 %v504_v3, 0.0 }
 0x20d   :  { %v523_v8 = vpack.c.bf16 %v516_v5, %v514_v4 }
 0x20e   :  { %v524_v9 = vpack.c.bf16 %v517_v7, %v515_v6 }
 0x210   :  { %539 = vmatprep.subr.bf16.mxu1 %v524_v9 }
 0x211   :  { %540 = vmatpush1.bf16.msra.mxu1 %v523_v8 }
 0x214   :  { %630 = vmatmul.mubr.msk.bf16.vlgmr.msra.gmra.mrb[12].mxu1 %vm531_vm2, %v518_v10 }
 0x2e7   :  { %v569_v12 = vpop.f32.mrb[12].mxu1 }
 0x2e8   :  { %v570_v13 = vadd.f32 %v569_v12, %v529_v11  ;;  %v571_v14 = vpop.f32.mrb[13].mxu1 }
 0x2e9   :  { %v572_v15 = vadd.f32 %v571_v14, %v529_v11  ;;  %v573_v16 = vpop.f32.mrb[14].mxu1 }
 0x2ea   :  { %v574_v17 = vpop.f32.mrb[15].mxu1 }
 0x2eb   :  { %v578_v18 = vcombine.low %v570_v13, %v572_v15 }
 0x2ed   :  { %631 = vst.sshfl [vmem:[#allocation2] sm:$0x33 pattern:$0x76325410] %v578_v18 }
 0x2ee   :  { %669 = shalt.err (!%p666_p4)
}
 0x2ef   :  { %s670_s8 = scalar_lea.hbm %s883_s7, 64 }
 0x2f0   :  { %p671_p5 = scmp.ne.s32.totalorder %s883_s7, %s670_s8  ;;  %p674_p6 = scmp.lt.u32.totalorder %s670_s8, %s883_s7 }
 0x2f2   :  { %p676_p7 = pnand %p674_p6, %p671_p5 }
 0x2f4   :  { %679 = shalt.err (!%p676_p7)
}
 0x2f5   :  { %597 = dma.vmem_to_hbm [thread:$0]  %s595_s28, 64, %s883_s7, [#allocation3]  }
 0x2f6   :  { %680 = dma.done.wait [#allocation3], 64  }
 0x2f7   :  { %681 = vsyncadd [#allocation3], 4294967232 }
 0x2f8   :  { %601 = vsyncpa [#allocation3], 1 }

</bundles_post_ra>
